<compile_context>
chip_gen: v7x
topology: tpu7x:2x2x1
jax: 0.10.0
libtpu: 0.0.40
codegen_flags: <defaults>
</compile_context>

<pallas_src>
import functools
from typing import NamedTuple

import jax
import jax.numpy as jnp
from jax.experimental import pallas as pl
from jax.experimental.pallas import tpu as pltpu


# ----------------------------------------------------------------------------------------------
# small helpers
# ----------------------------------------------------------------------------------------------
def _round_up(v, m):
    return (v + m - 1) // m * m


def _cdiv(a, b):
    return -(-a // b)


def _pad2(a, rows, cols):
    return jnp.pad(a, ((0, rows - a.shape[0]), (0, cols - a.shape[1])))


def _vmem_ceiling():
    """Generation-aware scoped-VMEM ceiling (~87% of physical per-core VMEM)."""
    try:
        cap = int(pltpu.get_tpu_info().vmem_capacity_bytes)
    except Exception:  # noqa: BLE001 - conservative fallback fits every generation (v7x = 64 MiB)
        cap = 64 << 20
    return (cap * 7) // 8


def _probe_copy_kernel(x_ref, o_ref):
    o_ref[...] = x_ref[...]


@functools.cache
def _single_buffering_supported():
    """Check that pl.Buffered(1) on a grid-constant BlockSpec compiles on this JAX/Mosaic."""
    try:
        x = jnp.zeros((8, 128), jnp.float32)
        f = pl.pallas_call(
            _probe_copy_kernel,
            out_shape=jax.ShapeDtypeStruct((8, 128), jnp.float32),
            grid=(2,),
            in_specs=[pl.BlockSpec((8, 128), lambda i: (0, 0), pipeline_mode=pl.Buffered(1))],
            out_specs=pl.BlockSpec((8, 128), lambda i: (0, 0)),
        )
        jax.block_until_ready(f(x))
        return True
    except Exception:  # noqa: BLE001 - fall back to default double-buffering
        return False


class Geom(NamedTuple):
    inp: int
    hid: int
    out: int
    inp_p: int
    hid_p: int
    out_p: int
    streaming: bool
    tile_hid: int
    vmem_ceiling: int


# ----------------------------------------------------------------------------------------------
# kernels
# ----------------------------------------------------------------------------------------------
def _mlp_kernel_resident(x_ref, w1_ref, b1_ref, w2_ref, b2_ref, w3_ref, b3_ref, o_ref):
    # x arrives f32; cast to bf16 in-kernel (hides under the MXU).  Dropout = identity (eval).
    xb = x_ref[...].astype(jnp.bfloat16)

    # Layer 1: Linear (eval BatchNorm folded into w1/b1) -> ReLU.
    h1 = jnp.dot(xb, w1_ref[...], preferred_element_type=jnp.float32)
    h1 = jnp.maximum(h1 + b1_ref[...], 0.0).astype(jnp.bfloat16)

    # Layer 2: Linear (eval BatchNorm folded into w2/b2) -> ReLU.
    h2 = jnp.dot(h1, w2_ref[...], preferred_element_type=jnp.float32)
    h2 = jnp.maximum(h2 + b2_ref[...], 0.0).astype(jnp.bfloat16)

    # Layer 3: Linear
    o_ref[...] = (jnp.dot(h2, w3_ref[...], preferred_element_type=jnp.float32)
                  + b3_ref[...]).astype(o_ref.dtype)


def _mlp_kernel_stream(x_ref, w1_ref, b1_ref, w2_ref, b2_ref, w3_ref, b3_ref, o_ref, acc_ref):
    """Hidden-dim streaming: grid = (batch_tiles, hid_panels).  w1 column-panels and w2
    row-panels are streamed; the layer-2 pre-activation is accumulated in f32 scratch."""
    k = pl.program_id(1)

    @pl.when(k == 0)
    def _():
        acc_ref[...] = jnp.zeros_like(acc_ref)

    xb = x_ref[...].astype(jnp.bfloat16)
    h1 = jnp.dot(xb, w1_ref[...], preferred_element_type=jnp.float32)
    h1 = jnp.maximum(h1 + b1_ref[...], 0.0).astype(jnp.bfloat16)
    acc_ref[...] += jnp.dot(h1, w2_ref[...], preferred_element_type=jnp.float32)

    @pl.when(k == pl.num_programs(1) - 1)
    def _():
        h2 = jnp.maximum(acc_ref[...] + b2_ref[...], 0.0).astype(jnp.bfloat16)
        o_ref[...] = (jnp.dot(h2, w3_ref[...], preferred_element_type=jnp.float32)
                      + b3_ref[...]).astype(o_ref.dtype)


# ----------------------------------------------------------------------------------------------
# one-time host-side parameter preparation (hoisted out of the per-call hot path)
# ----------------------------------------------------------------------------------------------
def prepare_params(params, *, tile_hid=512, force_streaming=False):
    """Fold eval-mode BatchNorm into the Linears, pad to MXU-friendly shapes, cast matmul
    operands to bf16, and decide resident-vs-streaming.  Call ONCE and reuse the result."""
    assert tile_hid % 128 == 0
    inp, hid = params["w1"].shape
    out = params["w3"].shape[1]

    inp_p = _round_up(inp, 128)
    out_p = _round_up(out, 128)

    vmem_ceiling = _vmem_ceiling()
    # Resident bf16 weight footprint (single-buffered).  If it exceeds ~half the cap, stream hid.
    resident_w_bytes = 2 * (2 * inp_p * _round_up(hid, 128) + inp_p * out_p)
    streaming = bool(force_streaming or resident_w_bytes > vmem_ceiling // 2)
    hid_p = _round_up(hid, tile_hid if streaming else 128)

    # Fold eval BN: (x@w + b) * scale + shift == x @ (w*scale) + (b*scale + shift)   (exact)
    w1f = params["w1"] * params["bn1_scale"]
    b1f = params["b1"] * params["bn1_scale"] + params["bn1_shift"]
    w2f = params["w2"] * params["bn2_scale"]
    b2f = params["b2"] * params["bn2_scale"] + params["bn2_shift"]

    weights = dict(
        w1=_pad2(w1f, inp_p, hid_p).astype(jnp.bfloat16),
        b1=_pad2(b1f, 1, hid_p),
        w2=_pad2(w2f, hid_p, inp_p).astype(jnp.bfloat16),
        b2=_pad2(b2f, 1, inp_p),
        w3=_pad2(params["w3"], inp_p, out_p).astype(jnp.bfloat16),
        b3=_pad2(params["b3"], 1, out_p),
    )
    geom = Geom(inp=inp, hid=hid, out=out, inp_p=inp_p, hid_p=hid_p, out_p=out_p,
                streaming=streaming, tile_hid=tile_hid, vmem_ceiling=int(vmem_ceiling))
    return weights, geom


# ----------------------------------------------------------------------------------------------
# forward pass
# ----------------------------------------------------------------------------------------------
@functools.partial(jax.jit, static_argnames=("geom", "tile_b", "out_dtype"))
def mlp_output_layer(x, weights, *, geom, tile_b=256, out_dtype=None):
    """x: (N, inp) f32.  weights/geom from prepare_params().  tile_b: batch tile (mult of 8;
    on v6e/v7x with large N, 512 is a good choice)."""
    assert tile_b % 8 == 0
    N, inp = x.shape
    assert inp == geom.inp
    if out_dtype is None:
        out_dtype = x.dtype  # caller dtype; pass jnp.bfloat16 to halve output writeback
    inp_p, hid_p, out_p = geom.inp_p, geom.hid_p, geom.out_p

    # Guarded activation pad: only the feature dim, only when it isn't already a 128-multiple.
    # Rows are never padded -- the grid uses cdiv and the last batch tile may be partial.
    x_p = x if inp == inp_p else jnp.pad(x, ((0, 0), (0, inp_p - inp)))

    # Batch tile: multiple of 8 sublanes; ensure >=2 tiles when possible so the "parallel"
    # batch axis can shard across v7x's two TensorCores (no effect on v5e/v6e).
    tb = min(tile_b, _round_up(N, 8))
    if _cdiv(N, tb) < 2 and N > 8:
        tb = _round_up(_cdiv(N, 2), 8)
    grid_b = _cdiv(N, tb)

    # Grid-constant operands: single-buffered when supported (their block never changes).
    buf1 = {"pipeline_mode": pl.Buffered(1)} if _single_buffering_supported() else {}

    def const(shape):
        return pl.BlockSpec(shape, lambda *_: (0,) * len(shape), **buf1)

    f32, bf16 = 4, 2
    x_item = jnp.dtype(x.dtype).itemsize
    o_item = jnp.dtype(out_dtype).itemsize

    if not geom.streaming:
        grid = (grid_b,)
        kernel = _mlp_kernel_resident
        in_specs = [
            pl.BlockSpec((tb, inp_p), lambda i: (i, 0)),       # x tile (f32, cast in-kernel)
            const((inp_p, hid_p)), const((1, hid_p)),          # w1', b1'  (BN folded)
            const((hid_p, inp_p)), const((1, inp_p)),          # w2', b2'
            const((inp_p, out_p)), const((1, out_p)),          # w3,  b3
        ]
        out_specs = pl.BlockSpec((tb, out_p), lambda i: (i, 0))
        scratch = []
        dims = ("parallel",)
        vmem = bf16 * (2 * inp_p * hid_p + inp_p * out_p)        # resident weights (x1)
        vmem += f32 * (hid_p + inp_p + out_p)                    # resident biases  (x1)
        vmem += 2 * tb * (inp_p * x_item + out_p * o_item)       # x / out tiles (double-buf)
        vmem += f32 * tb * (hid_p + inp_p)                       # h1 / h2 temporaries
    else:
        tk = geom.tile_hid
        grid = (grid_b, hid_p // tk)
        kernel = _mlp_kernel_stream
        in_specs = [
            pl.BlockSpec((tb, inp_p), lambda i, k: (i, 0)),      # x tile
            pl.BlockSpec((inp_p, tk), lambda i, k: (0, k)),      # w1' column panel
            pl.BlockSpec((1, tk),     lambda i, k: (0, k)),      # b1' panel
            pl.BlockSpec((tk, inp_p), lambda i, k: (k, 0)),      # w2' row panel
            const((1, inp_p)),                                   # b2'
            const((inp_p, out_p)), const((1, out_p)),            # w3, b3
        ]
        out_specs = pl.BlockSpec((tb, out_p), lambda i, k: (i, 0))
        scratch = [pltpu.VMEM((tb, inp_p), jnp.float32)]
        dims = ("parallel", "arbitrary")
        vmem = 2 * bf16 * (2 * inp_p * tk)                       # streamed w1/w2 panels (x2)
        vmem += 2 * f32 * tk                                     # streamed b1 panel
        vmem += bf16 * inp_p * out_p + f32 * (inp_p + out_p)     # resident w3/b2/b3 (x1)
        vmem += 2 * tb * (inp_p * x_item + out_p * o_item)       # x / out tiles (double-buf)
        vmem += f32 * tb * (inp_p + tk + inp_p)                  # acc scratch + h1/h2 temps

    vmem_bytes = int(min(max(vmem + (8 << 20), 32 << 20), geom.vmem_ceiling))

    out_padded = pl.pallas_call(
        kernel,
        out_shape=jax.ShapeDtypeStruct((N, out_p), out_dtype),
        grid=grid,
        in_specs=in_specs,
        out_specs=out_specs,
        scratch_shapes=scratch,
        compiler_params=pltpu.CompilerParams(
            dimension_semantics=dims, vmem_limit_bytes=vmem_bytes),
    )(x_p, weights["w1"], weights["b1"], weights["w2"], weights["b2"],
      weights["w3"], weights["b3"])

    return out_padded[:, :geom.out]


# ----------------------------------------------------------------------------------------------
# reference + init (PyTorch-equivalent, eval mode)
# ----------------------------------------------------------------------------------------------
def init_params(key, inp_size, out_size, ratio=4, eps=1e-5):
    hid = ratio * inp_size
    ks = jax.random.split(key, 10)

    def lin(kw, kb, fan_in, fan_out):
        # PyTorch nn.Linear default init: U(-1/sqrt(fan_in), 1/sqrt(fan_in))
        bound = 1.0 / jnp.sqrt(fan_in)
        w = jax.random.uniform(kw, (fan_in, fan_out), jnp.float32, -bound, bound)
        b = jax.random.uniform(kb, (1, fan_out), jnp.float32, -bound, bound)
        return w, b

    w1, b1 = lin(ks[0], ks[1], inp_size, hid)
    w2, b2 = lin(ks[2], ks[3], hid, inp_size)
    w3, b3 = lin(ks[4], ks[5], inp_size, out_size)

    def bn_fold(kg, km, n):
        # deterministic non-trivial BN stats (eval mode)
        gamma = 1.0 + 0.1 * jax.random.normal(kg, (1, n), jnp.float32)
        beta = 0.05 * jax.random.normal(km, (1, n), jnp.float32)
        running_mean = 0.1 * jax.random.normal(jax.random.fold_in(km, 1), (1, n), jnp.float32)
        running_var = 1.0 + 0.1 * jax.random.uniform(jax.random.fold_in(kg, 1), (1, n), jnp.float32)
        scale = gamma / jnp.sqrt(running_var + eps)
        shift = beta - running_mean * scale
        return scale, shift

    bn1_scale, bn1_shift = bn_fold(ks[6], ks[7], hid)
    bn2_scale, bn2_shift = bn_fold(ks[8], ks[9], inp_size)

    return dict(w1=w1, b1=b1, bn1_scale=bn1_scale, bn1_shift=bn1_shift,
                w2=w2, b2=b2, bn2_scale=bn2_scale, bn2_shift=bn2_shift,
                w3=w3, b3=b3)


def mlp_output_layer_ref(x, p):
    h1 = jnp.maximum((x @ p["w1"] + p["b1"]) * p["bn1_scale"] + p["bn1_shift"], 0.0)
    h2 = jnp.maximum((h1 @ p["w2"] + p["b2"]) * p["bn2_scale"] + p["bn2_shift"], 0.0)
    return h2 @ p["w3"] + p["b3"]


if __name__ == "__main__":
    key = jax.random.PRNGKey(0)
    k_x, k_p, k_x2, k_p2 = jax.random.split(key, 4)

    # ---- check 1: resident-weight path, caller (f32) output dtype ---------------------------
    N, inp_size, out_size = 8, 32, 8            # hidden = 4 * 32 = 128
    x = jax.random.normal(k_x, (N, inp_size), jnp.float32)
    params = init_params(k_p, inp_size, out_size)
    weights, geom = prepare_params(params)       # one-time BN fold + pad + bf16 cast
    out = jax.block_until_ready(mlp_output_layer(x, weights, geom=geom))
    ref = mlp_output_layer_ref(x, params)
    assert out.shape == (N, out_size) and out.dtype == jnp.float32
    # bf16 matmul operands (f32 accumulation) -> looser tolerance than pure f32
    assert jnp.allclose(out, ref, atol=5e-2, rtol=5e-2), float(jnp.max(jnp.abs(out - ref)))

    # ---- check 2: forced hidden-dim streaming path (2 K-panels), 2 batch tiles, bf16 output --
    N2, inp2, out2 = 24, 64, 8                  # hidden = 4 * 64 = 256 -> two 128-wide panels
    x2 = jax.random.normal(k_x2, (N2, inp2), jnp.float32)
    params2 = init_params(k_p2, inp2, out2)
    weights2, geom2 = prepare_params(params2, tile_hid=128, force_streaming=True)
    out2_ = jax.block_until_ready(
        mlp_output_layer(x2, weights2, geom=geom2, out_dtype=jnp.bfloat16))
    ref2 = mlp_output_layer_ref(x2, params2)
    assert out2_.shape == (N2, out2) and out2_.dtype == jnp.bfloat16
    err2 = jnp.max(jnp.abs(out2_.astype(jnp.float32) - ref2))
    assert jnp.allclose(out2_.astype(jnp.float32), ref2, atol=2e-1, rtol=1e-1), float(err2)

    print("KERNEL_OK")
</pallas_src>

<mosaic_0001>
module attributes {stable_mosaic.version = 11 : i64} {
  func.func @_mlp_kernel_resident(%arg0: i32, %arg1: memref<8x128xf32, #tpu.memory_space<vmem>>, %arg2: memref<128x128xbf16, #tpu.memory_space<vmem>>, %arg3: memref<1x128xf32, #tpu.memory_space<vmem>>, %arg4: memref<128x128xbf16, #tpu.memory_space<vmem>>, %arg5: memref<1x128xf32, #tpu.memory_space<vmem>>, %arg6: memref<128x128xbf16, #tpu.memory_space<vmem>>, %arg7: memref<1x128xf32, #tpu.memory_space<vmem>>, %arg8: memref<8x128xf32, #tpu.memory_space<vmem>>) attributes {dimension_semantics = [#tpu.dimension_semantics<parallel>], iteration_bounds = array<i64: 1>, scalar_prefetch = 0 : i64, scratch_operands = 0 : i64, tpu.core_type = #tpu.core_type<tc>, window_params = [{transform_indices = @transform_0, window_bounds = array<i64: 8, 128>}, {pipeline_mode = #tpu.pipeline_mode<synchronous>, transform_indices = @transform_1, window_bounds = array<i64: 128, 128>}, {pipeline_mode = #tpu.pipeline_mode<synchronous>, transform_indices = @transform_2, window_bounds = array<i64: 1, 128>}, {pipeline_mode = #tpu.pipeline_mode<synchronous>, transform_indices = @transform_3, window_bounds = array<i64: 128, 128>}, {pipeline_mode = #tpu.pipeline_mode<synchronous>, transform_indices = @transform_4, window_bounds = array<i64: 1, 128>}, {pipeline_mode = #tpu.pipeline_mode<synchronous>, transform_indices = @transform_5, window_bounds = array<i64: 128, 128>}, {pipeline_mode = #tpu.pipeline_mode<synchronous>, transform_indices = @transform_6, window_bounds = array<i64: 1, 128>}, {transform_indices = @transform_7, window_bounds = array<i64: 8, 128>}]} {
    %c0 = arith.constant 0 : index
    %c0_0 = arith.constant 0 : index
    %0 = vector.load %arg1[%c0, %c0_0] : memref<8x128xf32, #tpu.memory_space<vmem>>, vector<8x128xf32>
    %1 = arith.truncf %0 : vector<8x128xf32> to vector<8x128xbf16>
    %c0_1 = arith.constant 0 : index
    %c0_2 = arith.constant 0 : index
    %2 = vector.load %arg2[%c0_1, %c0_2] : memref<128x128xbf16, #tpu.memory_space<vmem>>, vector<128x128xbf16>
    %cst = arith.constant dense<0.000000e+00> : vector<8x128xf32>
    %3 = tpu.matmul %1, %2, %cst {dimension_numbers = #tpu.dot_dimension_numbers<[1], [0], [0], [1], [0, 0, 1, 1], [], []>} : vector<8x128xbf16>, vector<128x128xbf16>, vector<8x128xf32> -> vector<8x128xf32>
    %c0_3 = arith.constant 0 : index
    %c0_4 = arith.constant 0 : index
    %4 = vector.load %arg3[%c0_3, %c0_4] : memref<1x128xf32, #tpu.memory_space<vmem>>, vector<1x128xf32>
    %5 = vector.broadcast %4 : vector<1x128xf32> to vector<8x128xf32>
    %6 = arith.addf %3, %5 : vector<8x128xf32>
    %cst_5 = arith.constant 0.000000e+00 : f32
    %7 = vector.broadcast %cst_5 : f32 to vector<8x128xf32>
    %8 = arith.maximumf %6, %7 : vector<8x128xf32>
    %9 = arith.truncf %8 : vector<8x128xf32> to vector<8x128xbf16>
    %c0_6 = arith.constant 0 : index
    %c0_7 = arith.constant 0 : index
    %10 = vector.load %arg4[%c0_6, %c0_7] : memref<128x128xbf16, #tpu.memory_space<vmem>>, vector<128x128xbf16>
    %cst_8 = arith.constant dense<0.000000e+00> : vector<8x128xf32>
    %11 = tpu.matmul %9, %10, %cst_8 {dimension_numbers = #tpu.dot_dimension_numbers<[1], [0], [0], [1], [0, 0, 1, 1], [], []>} : vector<8x128xbf16>, vector<128x128xbf16>, vector<8x128xf32> -> vector<8x128xf32>
    %c0_9 = arith.constant 0 : index
    %c0_10 = arith.constant 0 : index
    %12 = vector.load %arg5[%c0_9, %c0_10] : memref<1x128xf32, #tpu.memory_space<vmem>>, vector<1x128xf32>
    %13 = vector.broadcast %12 : vector<1x128xf32> to vector<8x128xf32>
    %14 = arith.addf %11, %13 : vector<8x128xf32>
    %cst_11 = arith.constant 0.000000e+00 : f32
    %15 = vector.broadcast %cst_11 : f32 to vector<8x128xf32>
    %16 = arith.maximumf %14, %15 : vector<8x128xf32>
    %17 = arith.truncf %16 : vector<8x128xf32> to vector<8x128xbf16>
    %c0_12 = arith.constant 0 : index
    %c0_13 = arith.constant 0 : index
    %18 = vector.load %arg6[%c0_12, %c0_13] : memref<128x128xbf16, #tpu.memory_space<vmem>>, vector<128x128xbf16>
    %cst_14 = arith.constant dense<0.000000e+00> : vector<8x128xf32>
    %19 = tpu.matmul %17, %18, %cst_14 {dimension_numbers = #tpu.dot_dimension_numbers<[1], [0], [0], [1], [0, 0, 1, 1], [], []>} : vector<8x128xbf16>, vector<128x128xbf16>, vector<8x128xf32> -> vector<8x128xf32>
    %c0_15 = arith.constant 0 : index
    %c0_16 = arith.constant 0 : index
    %20 = vector.load %arg7[%c0_15, %c0_16] : memref<1x128xf32, #tpu.memory_space<vmem>>, vector<1x128xf32>
    %21 = vector.broadcast %20 : vector<1x128xf32> to vector<8x128xf32>
    %22 = arith.addf %19, %21 : vector<8x128xf32>
    %c0_17 = arith.constant 0 : index
    %c0_18 = arith.constant 0 : index
    %23 = vector.load %arg8[%c0_17, %c0_18] : memref<8x128xf32, #tpu.memory_space<vmem>>, vector<8x128xf32>
    tpu.vector_store %arg8[%c0_17, %c0_18], %22 {strides = array<i32>} : memref<8x128xf32, #tpu.memory_space<vmem>>, vector<8x128xf32>,
    return
  }
  func.func @transform_0(%arg0: i32) -> (i32, i32) {
    %c0_i32 = arith.constant 0 : i32
    %c0_i32_0 = arith.constant 0 : i32
    return %arg0, %c0_i32 : i32, i32
  }
  func.func @transform_1(%arg0: i32) -> (i32, i32) {
    %c0_i32 = arith.constant 0 : i32
    %c0_i32_0 = arith.constant 0 : i32
    %c0_i32_1 = arith.constant 0 : i32
    return %c0_i32, %c0_i32_0 : i32, i32
  }
  func.func @transform_2(%arg0: i32) -> (i32, i32) {
    %c0_i32 = arith.constant 0 : i32
    %c0_i32_0 = arith.constant 0 : i32
    %c0_i32_1 = arith.constant 0 : i32
    return %c0_i32, %c0_i32_0 : i32, i32
  }
  func.func @transform_3(%arg0: i32) -> (i32, i32) {
    %c0_i32 = arith.constant 0 : i32
    %c0_i32_0 = arith.constant 0 : i32
    %c0_i32_1 = arith.constant 0 : i32
    return %c0_i32, %c0_i32_0 : i32, i32
  }
  func.func @transform_4(%arg0: i32) -> (i32, i32) {
    %c0_i32 = arith.constant 0 : i32
    %c0_i32_0 = arith.constant 0 : i32
    %c0_i32_1 = arith.constant 0 : i32
    return %c0_i32, %c0_i32_0 : i32, i32
  }
  func.func @transform_5(%arg0: i32) -> (i32, i32) {
    %c0_i32 = arith.constant 0 : i32
    %c0_i32_0 = arith.constant 0 : i32
    %c0_i32_1 = arith.constant 0 : i32
    return %c0_i32, %c0_i32_0 : i32, i32
  }
  func.func @transform_6(%arg0: i32) -> (i32, i32) {
    %c0_i32 = arith.constant 0 : i32
    %c0_i32_0 = arith.constant 0 : i32
    %c0_i32_1 = arith.constant 0 : i32
    return %c0_i32, %c0_i32_0 : i32, i32
  }
  func.func @transform_7(%arg0: i32) -> (i32, i32) {
    %c0_i32 = arith.constant 0 : i32
    %c0_i32_0 = arith.constant 0 : i32
    return %arg0, %c0_i32 : i32, i32
  }
}

</mosaic_0001>

<bundles_post_ra>
// kernel: mlp_output_layer.1
= control target key start
LH: loop header
LB: loop body
LE: loop exit
PB: predicated region body
PF: predicated region fallthrough
CT: control target
= control target key end

     0   :  { %12 = vsyncpa [#allocation3], 0  ;;  %s819_s0 = inlined_call_operand.vmem [shape: f32[8,128], index: 0, kind: input, shape index: {}]   ;;  %s820_s1 = inlined_call_operand.hbm [shape: bf16[128,128], index: 1, kind: input, shape index: {}]   ;;  %s821_s2 = inlined_call_operand.vmem [shape: f32[1,128], index: 2, kind: input, shape index: {}]   ;;  %s822_s3 = inlined_call_operand.hbm [shape: bf16[128,128], index: 3, kind: input, shape index: {}]   ;;  %s823_s4 = inlined_call_operand.vmem [shape: f32[1,128], index: 4, kind: input, shape index: {}]   ;;  %s824_s5 = inlined_call_operand.hbm [shape: bf16[128,128], index: 5, kind: input, shape index: {}]   ;;  %s825_s6 = inlined_call_operand.vmem [shape: f32[1,128], index: 6, kind: input, shape index: {}]   ;;  %s826_s7 = inlined_call_operand.hbm [shape: f32[8,128], index: 7, kind: output, shape index: {}]  }
   0x1   :  { %13 = vsyncpa [#allocation6], 0 }
   0x2   :  { %14 = vsyncpa [#allocation4], 0  ;;  %s665_s24 = smov [#allocation5]   ;;  %s666_s26 = smov [#allocation2]  }
   0x3   :  { %s36_s25 = sshll.u32 %s665_s24, 4  ;;  %s22_s27 = sshll.u32 %s666_s26, 4  ;;  %s37_s25 = int_to_ptr.vmem [resolvable:$true] %s36_s25  ;;  %s713_s27 = int_to_ptr.vmem [resolvable:$true] %s22_s27 }
   0x4   :  { %s571_s30 = scalar_lea.hbm %s822_s3, 1024 }
   0x5   :  { %p572_p0 = scmp.ne.s32.totalorder %s822_s3, %s571_s30  ;;  %p575_p1 = scmp.lt.u32.totalorder %s571_s30, %s822_s3 }
   0x7   :  { %p577_p2 = pnand %p575_p1, %p572_p0 }
   0x9   :  { %580 = shalt.err (!%p577_p2)
}
   0xa   :  { %s581_s12 = scalar_lea.vmem %s37_s25, 1024  ;;  %p586_p4 = scmp.lt.s32.totalorder %s37_s25, %s37_s25 }
   0xb   :  { %p582_p3 = scmp.ne.s32.totalorder %s37_s25, %s581_s12  ;;  %p587_p5 = scmp.lt.s32.totalorder %s581_s12, %s581_s12 }
   0xd   :  { %p588_p6 = por %p587_p5, %p586_p4 }
   0xf   :  { %p589_p7 = pnand %p588_p6, %p582_p3 }
  0x11   :  { %592 = shalt.err (!%p589_p7)
}
  0x12   :  { %s667_s13 = smov 64   ;;  %s668_s14 = smov 4  }
  0x13   :  { %42 = dma.hbm_to_vmem [thread:$0]  %s822_s3, 1024, %s37_s25, [#allocation6], %s667_s13, %s667_s13, %s668_s14  }
  0x14   :  { %s593_s19 = scalar_lea.hbm %s820_s1, 1024 }
  0x15   :  { %p594_p8 = scmp.ne.s32.totalorder %s820_s1, %s593_s19  ;;  %p597_p9 = scmp.lt.u32.totalorder %s593_s19, %s820_s1 }
  0x17   :  { %p599_p10 = pnand %p597_p9, %p594_p8 }
  0x19   :  { %602 = shalt.err (!%p599_p10)
}
  0x1a   :  { %s603_s24 = scalar_lea.vmem %s713_s27, 1024  ;;  %p608_p12 = scmp.lt.s32.totalorder %s713_s27, %s713_s27 }
  0x1b   :  { %p604_p11 = scmp.ne.s32.totalorder %s713_s27, %s603_s24  ;;  %p609_p13 = scmp.lt.s32.totalorder %s603_s24, %s603_s24 }
  0x1d   :  { %p610_p0 = por %p609_p13, %p608_p12 }
  0x1f   :  { %p611_p1 = pnand %p610_p0, %p604_p11 }
  0x21   :  { %614 = shalt.err (!%p611_p1)
}
  0x22   :  { %28 = dma.hbm_to_vmem [thread:$0]  %s820_s1, 1024, %s713_s27, [#allocation3], %s667_s13, %s667_s13, %s668_s14  }
  0x23   :  { %s669_s26 = smov [#allocation7]   ;;  %s615_s8 = scalar_lea.hbm %s824_s5, 1024 }
  0x24   :  { %s50_s28 = sshll.u32 %s669_s26, 4  ;;  %p616_p2 = scmp.ne.s32.totalorder %s824_s5, %s615_s8  ;;  %s51_s28 = int_to_ptr.vmem [resolvable:$true] %s50_s28 }
  0x25   :  { %p619_p3 = scmp.lt.u32.totalorder %s615_s8, %s824_s5 }
  0x27   :  { %p621_p4 = pnand %p619_p3, %p616_p2 }
  0x29   :  { %624 = shalt.err (!%p621_p4)
}
  0x2a   :  { %s625_s15 = scalar_lea.vmem %s51_s28, 1024  ;;  %p630_p6 = scmp.lt.s32.totalorder %s51_s28, %s51_s28 }
  0x2b   :  { %p626_p5 = scmp.ne.s32.totalorder %s51_s28, %s625_s15  ;;  %p631_p7 = scmp.lt.s32.totalorder %s625_s15, %s625_s15 }
  0x2d   :  { %p632_p8 = por %p631_p7, %p630_p6 }
  0x2f   :  { %p633_p9 = pnand %p632_p8, %p626_p5 }
  0x31   :  { %636 = shalt.err (!%p633_p9)
}
  0x32   :  { %56 = dma.hbm_to_vmem [thread:$0]  %s824_s5, 1024, %s51_s28, [#allocation6], %s667_s13, %s667_s13, %s668_s14  }
  0x33   :  { %659 = dma.done.wait [#allocation3], 1024  }
  0x34   :  { %660 = vsyncadd [#allocation3], 4294966272 }
  0x35   :  { %661 = dma.done.wait [#allocation6], 2048  }
  0x36   :  { %662 = vsyncadd [#allocation6], 4294965248  ;;  %v670_v0 = vmov 0.0   ;;  %vm671_vm0 = vmmov 0   ;;  %v547_v1 = vld [vmem:[#allocation2] sm:$0xff]   ;;  %v548_v2 = vld [vmem:[#allocation2 + $0x8] sm:$0xff]  }
  0x37   :  { %479 = vmatprep.subr.bf16.mxu0 %v670_v0  ;;  %495 = vmatprep.mubr.msk.bf16.mxu0 %vm671_vm0, %v670_v0  ;;  %v549_v3 = vld [vmem:[#allocation2 + $0x10] sm:$0xff]   ;;  %v555_v4 = vld [vmem:[#allocation5] sm:$0xff]   ;;  %v550_v5 = vld [vmem:[#allocation2 + $0x18] sm:$0xff]   ;;  %s672_s19 = smov [#allocation8]  }
  0x38   :  { %499 = vmatprep.subr.bf16.mxu1 %v670_v0  ;;  %515 = vmatprep.mubr.msk.bf16.mxu1 %vm671_vm0, %v670_v0  ;;  %v556_v6 = vld [vmem:[#allocation5 + $0x8] sm:$0xff]   ;;  %v551_v7 = vld [vmem:[#allocation2 + $0x20] sm:$0xff]   ;;  %v557_v8 = vld [vmem:[#allocation5 + $0x10] sm:$0xff]   ;;  %s415_s20 = sshll.u32 %s672_s19, 4  ;;  %s416_s20 = int_to_ptr.vmem [resolvable:$true] %s415_s20 }
  0x39   :  { %480 = vmatpush3.bf16.msra.mxu0 %v547_v1  ;;  %500 = vmatpush3.bf16.msra.mxu1 %v555_v4  ;;  %v552_v9 = vld [vmem:[#allocation2 + $0x28] sm:$0xff]   ;;  %v558_v10 = vld [vmem:[#allocation5 + $0x18] sm:$0xff]   ;;  %v553_v11 = vld [vmem:[#allocation2 + $0x30] sm:$0xff]   ;;  %p642_p11 = scmp.lt.s32.totalorder %s416_s20, %s416_s20 }
  0x3a   :  { %481 = vmatprep.subr.bf16.mxu0 %v670_v0  ;;  %501 = vmatprep.subr.bf16.mxu1 %v670_v0  ;;  %v559_v12 = vld [vmem:[#allocation5 + $0x20] sm:$0xff]   ;;  %v554_v13 = vld [vmem:[#allocation2 + $0x38] sm:$0xff]   ;;  %v560_v15 = vld [vmem:[#allocation5 + $0x28] sm:$0xff]  }
  0x3b   :  { %v69_v14 = vld [vmem:[%s819_s0] sm:$0xff]  ;;  %v561_v17 = vld [vmem:[#allocation5 + $0x30] sm:$0xff]   ;;  %v562_v18 = vld [vmem:[#allocation5 + $0x38] sm:$0xff]  }
  0x3c   :  { %v70_v16 = vpack.c.bf16 %v69_v14, %v69_v14  ;;  %v563_v19 = vld [vmem:[#allocation7] sm:$0xff]   ;;  %v564_v20 = vld [vmem:[#allocation7 + $0x8] sm:$0xff]   ;;  %v565_v21 = vld [vmem:[#allocation7 + $0x10] sm:$0xff]  }
  0x3d   :  { %482 = vmatpush3.bf16.msra.mxu0 %v548_v2  ;;  %502 = vmatpush3.bf16.msra.mxu1 %v556_v6  ;;  %v566_v22 = vld [vmem:[#allocation7 + $0x18] sm:$0xff]   ;;  %v567_v23 = vld [vmem:[#allocation7 + $0x20] sm:$0xff]   ;;  %v568_v24 = vld [vmem:[#allocation7 + $0x28] sm:$0xff]  }
  0x3e   :  { %483 = vmatprep.subr.bf16.mxu0 %v670_v0  ;;  %503 = vmatprep.subr.bf16.mxu1 %v670_v0  ;;  %v425_v25 = vld [vmem:[%s821_s2] ss:$0 sm:$0xff]  ;;  %v569_v33 = vld [vmem:[#allocation7 + $0x30] sm:$0xff]   ;;  %v570_v34 = vld [vmem:[#allocation7 + $0x38] sm:$0xff]  }
  0x3f   :  { %v434_v35 = vld [vmem:[%s823_s4] ss:$0 sm:$0xff]  ;;  %s637_s4 = scalar_lea.vmem %s416_s20, 128 }
  0x40   :  { %v443_v43 = vld [vmem:[%s825_s6] ss:$0 sm:$0xff]  ;;  %p638_p10 = scmp.ne.s32.totalorder %s416_s20, %s637_s4  ;;  %p643_p12 = scmp.lt.s32.totalorder %s637_s4, %s637_s4 }
  0x41   :  { %484 = vmatpush3.bf16.msra.mxu0 %v549_v3  ;;  %504 = vmatpush3.bf16.msra.mxu1 %v557_v8 }
  0x42   :  { %485 = vmatprep.subr.bf16.mxu0 %v670_v0  ;;  %505 = vmatprep.subr.bf16.mxu1 %v670_v0  ;;  %p644_p13 = por %p643_p12, %p642_p11 }
  0x44   :  { %p645_p0 = pnand %p644_p13, %p638_p10 }
  0x45   :  { %486 = vmatpush3.bf16.msra.mxu0 %v550_v5  ;;  %506 = vmatpush3.bf16.msra.mxu1 %v558_v10 }
  0x46   :  { %487 = vmatprep.subr.bf16.mxu0 %v670_v0  ;;  %507 = vmatprep.subr.bf16.mxu1 %v670_v0 }
  0x49   :  { %488 = vmatpush3.bf16.msra.mxu0 %v551_v7  ;;  %508 = vmatpush3.bf16.msra.mxu1 %v559_v12 }
  0x4a   :  { %489 = vmatprep.subr.bf16.mxu0 %v670_v0  ;;  %509 = vmatprep.subr.bf16.mxu1 %v670_v0 }
  0x4d   :  { %490 = vmatpush3.bf16.msra.mxu0 %v552_v9  ;;  %510 = vmatpush3.bf16.msra.mxu1 %v560_v15 }
  0x4e   :  { %491 = vmatprep.subr.bf16.mxu0 %v670_v0  ;;  %511 = vmatprep.subr.bf16.mxu1 %v670_v0 }
  0x51   :  { %492 = vmatpush3.bf16.msra.mxu0 %v553_v11  ;;  %512 = vmatpush3.bf16.msra.mxu1 %v561_v17 }
  0x52   :  { %493 = vmatprep.subr.bf16.mxu0 %v670_v0  ;;  %513 = vmatprep.subr.bf16.mxu1 %v670_v0 }
  0x55   :  { %494 = vmatpush3.bf16.msra.mxu0 %v554_v13  ;;  %514 = vmatpush3.bf16.msra.mxu1 %v562_v18 }
  0x56   :  { %519 = vmatprep.subr.bf16.mxu0 %v670_v0 }
  0x58   :  { %496 = vmatmul.mubr.bf16.vlgmr.msra.gmra.mrb[0].mxu0 %v70_v16 }
  0x59   :  { %535 = vmatprep.mubr.msk.bf16.mxu0 %vm671_vm0, %v670_v0  ;;  %520 = vmatpush3.bf16.msra.mxu0 %v563_v19 }
  0x5a   :  { %521 = vmatprep.subr.bf16.mxu0 %v670_v0 }
  0x5d   :  { %522 = vmatpush3.bf16.msra.mxu0 %v564_v20 }
  0x5e   :  { %523 = vmatprep.subr.bf16.mxu0 %v670_v0 }
  0x61   :  { %524 = vmatpush3.bf16.msra.mxu0 %v565_v21 }
  0x62   :  { %525 = vmatprep.subr.bf16.mxu0 %v670_v0 }
  0x65   :  { %526 = vmatpush3.bf16.msra.mxu0 %v566_v22 }
  0x66   :  { %527 = vmatprep.subr.bf16.mxu0 %v670_v0 }
  0x69   :  { %528 = vmatpush3.bf16.msra.mxu0 %v567_v23 }
  0x6a   :  { %529 = vmatprep.subr.bf16.mxu0 %v670_v0 }
  0x6d   :  { %530 = vmatpush3.bf16.msra.mxu0 %v568_v24 }
  0x6e   :  { %531 = vmatprep.subr.bf16.mxu0 %v670_v0 }
  0x71   :  { %532 = vmatpush3.bf16.msra.mxu0 %v569_v33 }
  0x72   :  { %533 = vmatprep.subr.bf16.mxu0 %v670_v0 }
  0x75   :  { %534 = vmatpush3.bf16.msra.mxu0 %v570_v34 }
 0x12b   :  { %v176_v26 = vpop.f32.mrb[0].mxu0 }
 0x12c   :  { %v177_v27 = vadd.f32 %v425_v25, %v176_v26  ;;  %v497_v28 = vpop.f32.mrb[1].mxu0 }
 0x12d   :  { %v179_v29 = vpop.f32.mrb[2].mxu0 }
 0x12e   :  { %v182_v30 = vmax.f32 %v177_v27, 0.0  ;;  %v498_v31 = vpop.f32.mrb[3].mxu0 }
 0x130   :  { %v183_v32 = vpack.c.bf16 %v182_v30, %v182_v30 }
 0x132   :  { %516 = vmatmul.mubr.bf16.vlgmr.msra.gmra.mrb[0].mxu1 %v183_v32 }
 0x205   :  { %v289_v36 = vpop.f32.mrb[0].mxu1 }
 0x206   :  { %v290_v37 = vadd.f32 %v434_v35, %v289_v36  ;;  %v517_v38 = vpop.f32.mrb[1].mxu1 }
 0x207   :  { %v292_v39 = vpop.f32.mrb[2].mxu1 }
 0x208   :  { %v295_v40 = vmax.f32 %v290_v37, 0.0  ;;  %v518_v41 = vpop.f32.mrb[3].mxu1 }
 0x20a   :  { %v296_v42 = vpack.c.bf16 %v295_v40, %v295_v40 }
 0x20c   :  { %536 = vmatmul.mubr.bf16.vlgmr.msra.gmra.mrb[4].mxu0 %v296_v42 }
 0x2df   :  { %v402_v44 = vpop.f32.mrb[4].mxu0 }
 0x2e0   :  { %v403_v45 = vadd.f32 %v443_v43, %v402_v44  ;;  %v537_v46 = vpop.f32.mrb[5].mxu0 }
 0x2e1   :  { %v405_v47 = vpop.f32.mrb[6].mxu0 }
 0x2e2   :  { %408 = vst [vmem:[#allocation8] sm:$0xff] %v403_v45  ;;  %v538_v48 = vpop.f32.mrb[7].mxu0 }
 0x2e3   :  { %648 = shalt.err (!%p645_p0)
}
 0x2e4   :  { %s649_s6 = scalar_lea.hbm %s826_s7, 128 }
 0x2e5   :  { %p650_p1 = scmp.ne.s32.totalorder %s826_s7, %s649_s6  ;;  %p653_p2 = scmp.lt.u32.totalorder %s649_s6, %s826_s7 }
 0x2e7   :  { %p655_p3 = pnand %p653_p2, %p650_p1 }
 0x2e9   :  { %658 = shalt.err (!%p655_p3)
}
 0x2ea   :  { %418 = dma.vmem_to_hbm [thread:$0]  %s416_s20, 128, %s826_s7, [#allocation4]  }
 0x2eb   :  { %663 = dma.done.wait [#allocation4], 128  }
 0x2ec   :  { %664 = vsyncadd [#allocation4], 4294967168 }
 0x2ed   :  { %422 = vsyncpa [#allocation3], 1 }
 0x2ee   :  { %423 = vsyncpa [#allocation6], 1 }
 0x2ef   :  { %424 = vsyncpa [#allocation4], 1 }

</bundles_post_ra>
